<compile_context>
chip_gen: v7x
topology: tpu7x:2x2x1
jax: 0.10.0
libtpu: 0.0.40
codegen_flags: <defaults>
</compile_context>

<pallas_src>
import jax
import jax.numpy as jnp
from jax.experimental import pallas as pl
from jax.experimental.pallas import tpu as pltpu

EMBEDDING_SIZE = 200  # matches `embedding_size = 200` in the PyTorch file


def _round_up(x: int, m: int) -> int:
    return (x + m - 1) // m * m


# --------------------------------------------------------------------------
# Kernel
# --------------------------------------------------------------------------
def skip_gram_kernel(idx_ref, ew1_ref, w2_ref, b2_ref, out_ref):
    # idx_ref: (TB, 1) int32 word ids for this batch tile
    # ew1_ref: (V, E_pad)   folded Emb @ W1^T, resident in VMEM (mxu dtype)
    # w2_ref:  (E_pad, V_pad) W2^T, resident in VMEM (mxu dtype)
    # b2_ref:  (1, V_pad) f32 folded bias  b1 @ W2^T + b2
    # out_ref: (TB, V_pad) f32
    ids = idx_ref[...]                                        # (TB, 1) int32
    tb = ids.shape[0]
    vocab = ew1_ref.shape[0]
    mxu_dtype = ew1_ref.dtype

    # Embedding gather + Linear1 as one one-hot MXU matmul (bias folded away).
    cols = jax.lax.broadcasted_iota(jnp.int32, (tb, vocab), 1)  # (TB, V)
    one_hot = (cols == ids).astype(mxu_dtype)                   # (TB, V)
    h = jnp.dot(one_hot, ew1_ref[...],
                preferred_element_type=jnp.float32)             # (TB, E_pad) f32

    # Linear2 with the folded bias.
    o = jnp.dot(h.astype(mxu_dtype), w2_ref[...],
                preferred_element_type=jnp.float32) + b2_ref[...]  # (TB, V_pad) f32

    out_ref[...] = o.astype(out_ref.dtype)


# --------------------------------------------------------------------------
# One-time parameter preparation (hoisted out of the per-call path)
# --------------------------------------------------------------------------
def prepare_skip_gram_params(emb_table, w1, b1, w2, b2, *, mxu_dtype=jnp.bfloat16):
    """Fold Embedding∘Linear1 and b1∘Linear2, pad to lane-dense slabs.

    emb_table: (V, E) f32   nn.Embedding.weight
    w1, b1:    (E, E), (E,) nn.Linear(E, E) weight/bias (PyTorch (out, in) layout)
    w2, b2:    (V, E), (V,) nn.Linear(E, V) weight/bias
    Returns a dict of device arrays consumed by `skip_gram_forward`.
    """
    f32 = jnp.float32
    V, E = emb_table.shape
    assert w1.shape == (E, E) and w2.shape == (V, E)
    E_pad = _round_up(E, 128)          # 200 -> 256 : full, aligned MXU passes
    V_pad = _round_up(V, 128)          # 64  -> 128 : lane-dense (unmasked) stores

    # Folds are computed in f32, then stored in the MXU dtype.
    emb_w1 = emb_table.astype(f32) @ w1.astype(f32).T                       # (V, E)
    b2_fold = (b1.reshape(-1).astype(f32) @ w2.astype(f32).T
               + b2.reshape(-1).astype(f32))                                # (V,)

    emb_w1_p = jnp.zeros((V, E_pad), mxu_dtype).at[:, :E].set(emb_w1.astype(mxu_dtype))
    w2_p = jnp.zeros((E_pad, V_pad), mxu_dtype).at[:E, :V].set(w2.T.astype(mxu_dtype))
    b2_p = jnp.zeros((1, V_pad), f32).at[0, :V].set(b2_fold)
    return {"emb_w1": emb_w1_p, "w2": w2_p, "b2": b2_p}


# --------------------------------------------------------------------------
# Per-call forward
# --------------------------------------------------------------------------
def skip_gram_forward(idx, params, *, batch_tile=256):
    """Forward pass: idx (B,) int ids -> (B, V) f32 logits."""
    B = int(idx.shape[0])
    emb_w1_p, w2_p, b2_p = params["emb_w1"], params["w2"], params["b2"]
    V, E_pad = emb_w1_p.shape
    V_pad = w2_p.shape[1]

    # Right-size the batch tile: sublane multiple of 8, capped at batch_tile.
    # (On v7x pick batch_tile so large batches produce >= 2 grid tiles and the
    #  'parallel' axis shards across both TensorCores.)
    TB = min(batch_tile, _round_up(B, 8))
    B_pad = _round_up(B, TB)

    # Pad the batch with id 0; padded rows are sliced away below.
    idx_p = jnp.zeros((B_pad, 1), jnp.int32).at[:B, 0].set(idx.astype(jnp.int32))

    out = pl.pallas_call(
        skip_gram_kernel,
        out_shape=jax.ShapeDtypeStruct((B_pad, V_pad), jnp.float32),
        grid_spec=pltpu.PrefetchScalarGridSpec(
            num_scalar_prefetch=0,
            grid=(B_pad // TB,),
            in_specs=[
                pl.BlockSpec((TB, 1), lambda i: (i, 0)),          # ids per batch tile
                pl.BlockSpec((V, E_pad), lambda i: (0, 0)),       # folded Emb@W1^T
                pl.BlockSpec((E_pad, V_pad), lambda i: (0, 0)),   # W2^T
                pl.BlockSpec((1, V_pad), lambda i: (0, 0)),       # folded bias
            ],
            out_specs=pl.BlockSpec((TB, V_pad), lambda i: (i, 0)),
        ),
        compiler_params=pltpu.CompilerParams(
            dimension_semantics=("parallel",)),   # independent batch tiles
    )(idx_p, emb_w1_p, w2_p, b2_p)

    return out[:B, :V]


# --------------------------------------------------------------------------
# Pure-f32 reference with the original module's semantics (PyTorch order).
# --------------------------------------------------------------------------
def reference_forward(idx, emb_table, w1, b1, w2, b2):
    e = emb_table[idx]                       # Embedding
    h = e @ w1.T + b1.reshape(-1)            # Linear1
    o = h @ w2.T + b2.reshape(-1)            # Linear2
    return o


if __name__ == "__main__":
    vocab_size = 64
    E = EMBEDDING_SIZE
    batch = 8

    key = jax.random.PRNGKey(0)
    k_emb, k_w1, k_b1, k_w2, k_b2, k_idx = jax.random.split(key, 6)

    # Deterministic synthetic parameters, PyTorch nn.Linear layout (out, in).
    emb_table = jax.random.normal(k_emb, (vocab_size, E), dtype=jnp.float32)
    w1 = jax.random.normal(k_w1, (E, E), dtype=jnp.float32) * 0.05
    b1 = jax.random.normal(k_b1, (E,), dtype=jnp.float32) * 0.05
    w2 = jax.random.normal(k_w2, (vocab_size, E), dtype=jnp.float32) * 0.05
    b2 = jax.random.normal(k_b2, (vocab_size,), dtype=jnp.float32) * 0.05

    # Input: batch of word ids, like the PyTorch forward's integer tensor x.
    idx = jax.random.randint(k_idx, (batch,), 0, vocab_size, dtype=jnp.int32)

    ref = reference_forward(idx, emb_table, w1, b1, w2, b2)

    # 1) Exact-semantics check: pure f32 operands (small tile, grid of 1).
    params_f32 = prepare_skip_gram_params(emb_table, w1, b1, w2, b2,
                                          mxu_dtype=jnp.float32)
    out_f32 = jax.block_until_ready(skip_gram_forward(idx, params_f32))
    assert out_f32.shape == (batch, vocab_size)
    assert out_f32.dtype == jnp.float32
    assert jnp.allclose(out_f32, ref, atol=1e-3, rtol=1e-3)

    # 2) Performance configuration: bf16 MXU operands, f32 accumulation.
    params_bf16 = prepare_skip_gram_params(emb_table, w1, b1, w2, b2,
                                           mxu_dtype=jnp.bfloat16)
    out_bf16 = jax.block_until_ready(skip_gram_forward(idx, params_bf16))
    assert out_bf16.shape == (batch, vocab_size)
    assert jnp.allclose(out_bf16, ref, atol=5e-2, rtol=5e-2)

    # 3) Multi-tile grid sanity check (exercises the pipelined batch axis).
    idx_big = jax.random.randint(jax.random.PRNGKey(1), (48,), 0, vocab_size,
                                 dtype=jnp.int32)
    ref_big = reference_forward(idx_big, emb_table, w1, b1, w2, b2)
    out_big = jax.block_until_ready(
        skip_gram_forward(idx_big, params_bf16, batch_tile=16))  # grid = (3,)
    assert out_big.shape == (48, vocab_size)
    assert jnp.allclose(out_big, ref_big, atol=5e-2, rtol=5e-2)

    print("KERNEL_OK")
</pallas_src>

<mosaic_0001>
module attributes {stable_mosaic.version = 11 : i64} {
  func.func @skip_gram_kernel(%arg0: i32, %arg1: memref<8x1xi32, #tpu.memory_space<vmem>>, %arg2: memref<64x256xf32, #tpu.memory_space<vmem>>, %arg3: memref<256x128xf32, #tpu.memory_space<vmem>>, %arg4: memref<1x128xf32, #tpu.memory_space<vmem>>, %arg5: memref<8x128xf32, #tpu.memory_space<vmem>>) attributes {dimension_semantics = [#tpu.dimension_semantics<parallel>], iteration_bounds = array<i64: 1>, scalar_prefetch = 0 : i64, scratch_operands = 0 : i64, tpu.core_type = #tpu.core_type<tc>, window_params = [{transform_indices = @transform_0, window_bounds = array<i64: 8, 1>}, {pipeline_mode = #tpu.pipeline_mode<synchronous>, transform_indices = @transform_1, window_bounds = array<i64: 64, 256>}, {pipeline_mode = #tpu.pipeline_mode<synchronous>, transform_indices = @transform_2, window_bounds = array<i64: 256, 128>}, {pipeline_mode = #tpu.pipeline_mode<synchronous>, transform_indices = @transform_3, window_bounds = array<i64: 1, 128>}, {transform_indices = @transform_4, window_bounds = array<i64: 8, 128>}]} {
    %c0 = arith.constant 0 : index
    %c0_0 = arith.constant 0 : index
    %0 = vector.load %arg1[%c0, %c0_0] : memref<8x1xi32, #tpu.memory_space<vmem>>, vector<8x1xi32>
    %1 = tpu.iota {dimensions = array<i32: 1>} : vector<8x64xi32>
    %2 = vector.broadcast %0 : vector<8x1xi32> to vector<8x64xi32>
    %3 = arith.cmpi eq, %1, %2 : vector<8x64xi32>
    %4 = arith.extui %3 : vector<8x64xi1> to vector<8x64xi32>
    %5 = arith.sitofp %4 : vector<8x64xi32> to vector<8x64xf32>
    %c0_1 = arith.constant 0 : index
    %c0_2 = arith.constant 0 : index
    %6 = vector.load %arg2[%c0_1, %c0_2] : memref<64x256xf32, #tpu.memory_space<vmem>>, vector<64x256xf32>
    %cst = arith.constant dense<0.000000e+00> : vector<8x256xf32>
    %7 = tpu.matmul %5, %6, %cst {dimension_numbers = #tpu.dot_dimension_numbers<[1], [0], [0], [1], [0, 0, 1, 1], [], []>} : vector<8x64xf32>, vector<64x256xf32>, vector<8x256xf32> -> vector<8x256xf32>
    %c0_3 = arith.constant 0 : index
    %c0_4 = arith.constant 0 : index
    %8 = vector.load %arg3[%c0_3, %c0_4] : memref<256x128xf32, #tpu.memory_space<vmem>>, vector<256x128xf32>
    %cst_5 = arith.constant dense<0.000000e+00> : vector<8x128xf32>
    %9 = tpu.matmul %7, %8, %cst_5 {dimension_numbers = #tpu.dot_dimension_numbers<[1], [0], [0], [1], [0, 0, 1, 1], [], []>} : vector<8x256xf32>, vector<256x128xf32>, vector<8x128xf32> -> vector<8x128xf32>
    %c0_6 = arith.constant 0 : index
    %c0_7 = arith.constant 0 : index
    %10 = vector.load %arg4[%c0_6, %c0_7] : memref<1x128xf32, #tpu.memory_space<vmem>>, vector<1x128xf32>
    %11 = vector.broadcast %10 : vector<1x128xf32> to vector<8x128xf32>
    %12 = arith.addf %9, %11 : vector<8x128xf32>
    %c0_8 = arith.constant 0 : index
    %c0_9 = arith.constant 0 : index
    %13 = vector.load %arg5[%c0_8, %c0_9] : memref<8x128xf32, #tpu.memory_space<vmem>>, vector<8x128xf32>
    tpu.vector_store %arg5[%c0_8, %c0_9], %12 {strides = array<i32>} : memref<8x128xf32, #tpu.memory_space<vmem>>, vector<8x128xf32>,
    return
  }
  func.func @transform_0(%arg0: i32) -> (i32, i32) {
    %c0_i32 = arith.constant 0 : i32
    %c0_i32_0 = arith.constant 0 : i32
    return %arg0, %c0_i32 : i32, i32
  }
  func.func @transform_1(%arg0: i32) -> (i32, i32) {
    %c0_i32 = arith.constant 0 : i32
    %c0_i32_0 = arith.constant 0 : i32
    %c0_i32_1 = arith.constant 0 : i32
    return %c0_i32, %c0_i32_0 : i32, i32
  }
  func.func @transform_2(%arg0: i32) -> (i32, i32) {
    %c0_i32 = arith.constant 0 : i32
    %c0_i32_0 = arith.constant 0 : i32
    %c0_i32_1 = arith.constant 0 : i32
    return %c0_i32, %c0_i32_0 : i32, i32
  }
  func.func @transform_3(%arg0: i32) -> (i32, i32) {
    %c0_i32 = arith.constant 0 : i32
    %c0_i32_0 = arith.constant 0 : i32
    %c0_i32_1 = arith.constant 0 : i32
    return %c0_i32, %c0_i32_0 : i32, i32
  }
  func.func @transform_4(%arg0: i32) -> (i32, i32) {
    %c0_i32 = arith.constant 0 : i32
    %c0_i32_0 = arith.constant 0 : i32
    return %arg0, %c0_i32 : i32, i32
  }
}

</mosaic_0001>

<bundles_post_ra>
// kernel: tpu_custom_call.1
= control target key start
LH: loop header
LB: loop body
LE: loop exit
PB: predicated region body
PF: predicated region fallthrough
CT: control target
= control target key end

     0   :  { %9 = vsyncpa [#allocation3], 0  ;;  %s518_s0 = inlined_call_operand.vmem [shape: s32[8,1], index: 0, kind: input, shape index: {}]   ;;  %s519_s1 = inlined_call_operand.hbm [shape: f32[64,256], index: 1, kind: input, shape index: {}]   ;;  %s520_s2 = inlined_call_operand.hbm [shape: f32[256,128], index: 2, kind: input, shape index: {}]   ;;  %s521_s3 = inlined_call_operand.vmem [shape: f32[1,128], index: 3, kind: input, shape index: {}]   ;;  %s522_s4 = inlined_call_operand.hbm [shape: f32[8,128], index: 4, kind: output, shape index: {}]  }
   0x1   :  { %10 = vsyncpa [#allocation6], 0 }
   0x2   :  { %11 = vsyncpa [#allocation4], 0  ;;  %s440_s15 = smov [#allocation2]   ;;  %s368_s19 = scalar_lea.hbm %s519_s1, 2048 }
   0x3   :  { %s19_s16 = sshll.u32 %s440_s15, 4  ;;  %p369_p0 = scmp.ne.s32.totalorder %s519_s1, %s368_s19  ;;  %s20_s16 = int_to_ptr.vmem [resolvable:$true] %s19_s16 }
   0x4   :  { %p372_p1 = scmp.lt.u32.totalorder %s368_s19, %s519_s1 }
   0x6   :  { %p374_p2 = pnand %p372_p1, %p369_p0 }
   0x8   :  { %377 = shalt.err (!%p374_p2)
}
   0x9   :  { %s378_s24 = scalar_lea.vmem %s20_s16, 2048  ;;  %p383_p4 = scmp.lt.s32.totalorder %s20_s16, %s20_s16 }
   0xa   :  { %p379_p3 = scmp.ne.s32.totalorder %s20_s16, %s378_s24  ;;  %p384_p5 = scmp.lt.s32.totalorder %s378_s24, %s378_s24 }
   0xc   :  { %p385_p6 = por %p384_p5, %p383_p4 }
   0xe   :  { %p386_p7 = pnand %p385_p6, %p379_p3 }
  0x10   :  { %389 = shalt.err (!%p386_p7)
}
  0x11   :  { %s441_s25 = smov 256   ;;  %s442_s26 = smov 16  }
  0x12   :  { %25 = dma.hbm_to_vmem [thread:$0]  %s519_s1, 2048, %s20_s16, [#allocation3], %s441_s25, %s441_s25, %s442_s26  }
  0x13   :  { %s443_s29 = smov [#allocation5]   ;;  %s390_s7 = scalar_lea.hbm %s520_s2, 4096 }
  0x14   :  { %s31_s30 = sshll.u32 %s443_s29, 4  ;;  %p391_p8 = scmp.ne.s32.totalorder %s520_s2, %s390_s7  ;;  %s32_s30 = int_to_ptr.vmem [resolvable:$true] %s31_s30 }
  0x15   :  { %p394_p9 = scmp.lt.u32.totalorder %s390_s7, %s520_s2 }
  0x17   :  { %p396_p10 = pnand %p394_p9, %p391_p8 }
  0x19   :  { %399 = shalt.err (!%p396_p10)
}
  0x1a   :  { %s400_s12 = scalar_lea.vmem %s32_s30, 4096  ;;  %p405_p12 = scmp.lt.s32.totalorder %s32_s30, %s32_s30 }
  0x1b   :  { %p401_p11 = scmp.ne.s32.totalorder %s32_s30, %s400_s12  ;;  %p406_p13 = scmp.lt.s32.totalorder %s400_s12, %s400_s12 }
  0x1d   :  { %p407_p0 = por %p406_p13, %p405_p12 }
  0x1f   :  { %p408_p1 = pnand %p407_p0, %p401_p11 }
  0x21   :  { %411 = shalt.err (!%p408_p1)
}
  0x22   :  { %s444_s1 = smov 128   ;;  %s445_s13 = smov 8  }
  0x23   :  { %37 = dma.hbm_to_vmem [thread:$0]  %s520_s2, 4096, %s32_s30, [#allocation6], %s444_s1, %s444_s1, %s445_s13  }
  0x24   :  { %434 = dma.done.wait [#allocation3], 2048  }
  0x25   :  { %435 = vsyncadd [#allocation3], 4294965248 }
  0x26   :  { %436 = dma.done.wait [#allocation6], 4096  }
  0x27   :  { %437 = vsyncadd [#allocation6], 4294963200  ;;  %v446_v0 = vmov 0   ;;  %v46_v1 = vld [vmem:[%s518_s0] sm:$0xff]  ;;  %v56_v2 = vld [vmem:[#allocation2 + $0x8] sm:$0xff]  ;;  %v447_v12 = vmov 0.0  }
  0x28   :  { %367 = vset.pattern.permute.xlu0 %v446_v0  ;;  %v58_v3 = vld [vmem:[#allocation2 + $0x18] sm:$0xff]  ;;  %v55_v5 = vld [vmem:[#allocation2] sm:$0xff]  ;;  %v57_v6 = vld [vmem:[#allocation2 + $0x10] sm:$0xff]  ;;  %139 = vmatprep.mubr.f32.mxu0 %v447_v12  ;;  %vm71_vm0 = vcmask 523264   ;;  %s448_s18 = smov [#allocation7]  }
  0x29   :  { %50 = vperm.xlu0 %367, %v46_v1   ;;  %v310_v4 = vpack.c.bf16 %v58_v3, %v56_v2  ;;  %v60_v7 = vld [vmem:[#allocation2 + $0x28] sm:$0xff]  ;;  %v312_v8 = vpack.c.bf16 %v57_v6, %v55_v5  ;;  %v62_v9 = vld [vmem:[#allocation2 + $0x38] sm:$0xff]  ;;  %v59_v10 = vld [vmem:[#allocation2 + $0x20] sm:$0xff]  ;;  %s262_s19 = sshll.u32 %s448_s18, 4  ;;  %s263_s19 = int_to_ptr.vmem [resolvable:$true] %s262_s19 }
  0x2a   :  { %v61_v11 = vld [vmem:[#allocation2 + $0x30] sm:$0xff]  ;;  %v314_v13 = vpack.c.bf16 %v62_v9, %v60_v7  ;;  %v64_v14 = vld [vmem:[#allocation2 + $0x48] sm:$0xff]  ;;  %v66_v15 = vld [vmem:[#allocation2 + $0x58] sm:$0xff]  ;;  %s412_s20 = scalar_lea.vmem %s263_s19, 128  ;;  %p417_p3 = scmp.lt.s32.totalorder %s263_s19, %s263_s19 }
  0x2b   :  { %311 = vmatprep.subr.bf16.mxu0 %v310_v4  ;;  %v316_v16 = vpack.c.bf16 %v61_v11, %v59_v10  ;;  %v63_v17 = vld [vmem:[#allocation2 + $0x40] sm:$0xff]  ;;  %v65_v18 = vld [vmem:[#allocation2 + $0x50] sm:$0xff]  ;;  %v318_v19 = vpack.c.bf16 %v66_v15, %v64_v14  ;;  %v68_v20 = vld [vmem:[#allocation2 + $0x68] sm:$0xff]  ;;  %p413_p2 = scmp.ne.s32.totalorder %s263_s19, %s412_s20  ;;  %p418_p4 = scmp.lt.s32.totalorder %s412_s20, %s412_s20 }
  0x2c   :  { %313 = vmatpush1.bf16.msra.mxu0 %v312_v8  ;;  %v70_v21 = vld [vmem:[#allocation2 + $0x78] sm:$0xff]  ;;  %v162_v22 = vld [vmem:[#allocation5 + $0x80] sm:$0xff]  ;;  %v163_v23 = vld [vmem:[#allocation5 + $0x88] sm:$0xff]  ;;  %v320_v31 = vpack.c.bf16 %v65_v18, %v63_v17  ;;  %v47_v8 = vlaneseq }
  0x2d   :  { %315 = vmatprep.subr.bf16.mxu0 %v314_v13  ;;  %v146_v24 = vld [vmem:[#allocation5] sm:$0xff]  ;;  %v147_v25 = vld [vmem:[#allocation5 + $0x8] sm:$0xff]  ;;  %v326_v26 = vpack.c.bf16 %v163_v23, %v162_v22  ;;  %v164_v28 = vld [vmem:[#allocation5 + $0x90] sm:$0xff]  ;;  %v322_v36 = vpack.c.bf16 %v70_v21, %v68_v20  ;;  %p419_p5 = por %p418_p4, %p417_p3 }
  0x2e   :  { %v328_v27 = vpack.c.bf16 %v147_v25, %v146_v24  ;;  %v165_v29 = vld [vmem:[#allocation5 + $0x98] sm:$0xff]  ;;  %v148_v30 = vld [vmem:[#allocation5 + $0x10] sm:$0xff]  ;;  %v166_v34 = vld [vmem:[#allocation5 + $0xa0] sm:$0xff]  ;;  %v48_v9 = vand.u32 127, %v47_v8 }
  0x2f   :  { %v330_v32 = vpack.c.bf16 %v165_v29, %v164_v28  ;;  %v149_v33 = vld [vmem:[#allocation5 + $0x18] sm:$0xff]  ;;  %v167_v35 = vld [vmem:[#allocation5 + $0xa8] sm:$0xff]  ;;  %v67_v37 = vld [vmem:[#allocation2 + $0x60] sm:$0xff]  ;;  %327 = vmatprep.subr.bf16.mxu1 %v326_v26  ;;  %p420_p6 = pnand %p419_p5, %p413_p2 }
  0x30   :  { %317 = vmatpush1.bf16.msra.mxu0 %v316_v16  ;;  %v69_v38 = vld [vmem:[#allocation2 + $0x70] sm:$0xff]  ;;  %329 = vmatpush3.bf16.msra.mxu1 %v328_v27  ;;  %v332_v39 = vpack.c.bf16 %v149_v33, %v148_v30  ;;  %v334_v40 = vpack.c.bf16 %v167_v35, %v166_v34  ;;  %v150_v41 = vld [vmem:[#allocation5 + $0x20] sm:$0xff]  ;;  %v151_v42 = vld [vmem:[#allocation5 + $0x28] sm:$0xff] }
  0x31   :  { %319 = vmatprep.subr.bf16.mxu0 %v318_v19  ;;  %331 = vmatprep.subr.bf16.mxu1 %v330_v32  ;;  %v324_v43 = vpack.c.bf16 %v69_v38, %v67_v37  ;;  %v168_v44 = vld [vmem:[#allocation5 + $0xb0] sm:$0xff]  ;;  %v169_v45 = vld [vmem:[#allocation5 + $0xb8] sm:$0xff]  ;;  %v336_v46 = vpack.c.bf16 %v151_v42, %v150_v41  ;;  %v170_v50 = vld [vmem:[#allocation5 + $0xc0] sm:$0xff] }
  0x32   :  { %v338_v47 = vpack.c.bf16 %v169_v45, %v168_v44  ;;  %v152_v48 = vld [vmem:[#allocation5 + $0x30] sm:$0xff]  ;;  %v153_v49 = vld [vmem:[#allocation5 + $0x38] sm:$0xff]  ;;  %v171_v51 = vld [vmem:[#allocation5 + $0xc8] sm:$0xff] }
  0x33   :  { %v340_v52 = vpack.c.bf16 %v153_v49, %v152_v48  ;;  %v342_v53 = vpack.c.bf16 %v171_v51, %v170_v50  ;;  %v154_v54 = vld [vmem:[#allocation5 + $0x40] sm:$0xff]  ;;  %v155_v55 = vld [vmem:[#allocation5 + $0x48] sm:$0xff]  ;;  %v172_v56 = vld [vmem:[#allocation5 + $0xd0] sm:$0xff] }
  0x34   :  { %321 = vmatpush1.bf16.msra.mxu0 %v320_v31  ;;  %333 = vmatpush3.bf16.msra.mxu1 %v332_v39  ;;  %v173_v57 = vld [vmem:[#allocation5 + $0xd8] sm:$0xff]  ;;  %v344_v58 = vpack.c.bf16 %v155_v55, %v154_v54  ;;  %v156_v60 = vld [vmem:[#allocation5 + $0x50] sm:$0xff]  ;;  %v174_v62 = vld [vmem:[#allocation5 + $0xe0] sm:$0xff] }
  0x35   :  { %323 = vmatprep.subr.bf16.mxu0 %v322_v36  ;;  %335 = vmatprep.subr.bf16.mxu1 %v334_v40  ;;  %v346_v59 = vpack.c.bf16 %v173_v57, %v172_v56  ;;  %v157_v61 = vld [vmem:[#allocation5 + $0x58] sm:$0xff]  ;;  %v175_v63 = vld [vmem:[#allocation5 + $0xe8] sm:$0xff]  ;;  %v158_v2 = vld [vmem:[#allocation5 + $0x60] sm:$0xff] }
  0x36   :  { %v348_v0 = vpack.c.bf16 %v157_v61, %v156_v60  ;;  %v350_v1 = vpack.c.bf16 %v175_v63, %v174_v62  ;;  %v159_v3 = vld [vmem:[#allocation5 + $0x68] sm:$0xff]  ;;  %v176_v4 = vld [vmem:[#allocation5 + $0xf0] sm:$0xff]  ;;  %v177_v5 = vld [vmem:[#allocation5 + $0xf8] sm:$0xff] }
  0x37   :  { %v352_v6 = vpack.c.bf16 %v159_v3, %v158_v2  ;;  %v354_v7 = vpack.c.bf16 %v177_v5, %v176_v4  ;;  %v160_v13 = vld [vmem:[#allocation5 + $0x70] sm:$0xff]  ;;  %v161_v14 = vld [vmem:[#allocation5 + $0x78] sm:$0xff] }
  0x38   :  { %325 = vmatpush1.bf16.msra.mxu0 %v324_v43  ;;  %337 = vmatpush3.bf16.msra.mxu1 %v336_v46  ;;  %v356_v15 = vpack.c.bf16 %v161_v14, %v160_v13  ;;  %v274_v19 = vld [vmem:[%s521_s3] ss:$0 sm:$0xff] }
  0x39   :  { %339 = vmatprep.subr.bf16.mxu1 %v338_v47 }
  0x3c   :  { %341 = vmatpush3.bf16.msra.mxu1 %v340_v52 }
  0x3d   :  { %343 = vmatprep.subr.bf16.mxu1 %v342_v53 }
  0x40   :  { %345 = vmatpush3.bf16.msra.mxu1 %v344_v58 }
  0x41   :  { %347 = vmatprep.subr.bf16.mxu1 %v346_v59 }
  0x44   :  { %349 = vmatpush3.bf16.msra.mxu1 %v348_v0 }
  0x45   :  { %351 = vmatprep.subr.bf16.mxu1 %v350_v1 }
  0x48   :  { %353 = vmatpush3.bf16.msra.mxu1 %v352_v6 }
  0x49   :  { %355 = vmatprep.subr.bf16.mxu1 %v354_v7 }
  0x4c   :  { %357 = vmatpush3.bf16.msra.mxu1 %v356_v15 }
  0xa8   :  { %v51_v10 = vpop.permute.xlu0 %50 }
  0xa9   :  { %vm52_vm1 = vcmp.eq.s32.totalorder %v48_v9, %v51_v10 }
  0xaa   :  { %v272_v11 = vsel %vm52_vm1, 1.0, %v447_v12 }
  0xab   :  { %273 = vmatmul.mubr.msk.f32.vlgmr.msra.gmra.mrb[0].mxu0 %vm71_vm0, %v272_v11 }
 0x17e   :  { %v141_v16 = vpop.f32.mrb[0].mxu0 }
 0x17f   :  { %v143_v17 = vpop.f32.mrb[1].mxu0 }
 0x180   :  { %249 = vmatprep.mubr.f32.mxu1 %v143_v17 }
 0x181   :  { %250 = vmatmul.mubr.f32.vlgmr.msra.gmra.mrb[0].mxu1 %v141_v16 }
 0x254   :  { %v307_v18 = vpop.f32.mrb[0].mxu1 }
 0x255   :  { %v308_v20 = vpop.f32.mrb[1].mxu1 }
 0x256   :  { %v309_v21 = vadd.f32 %v308_v20, %v307_v18 }
 0x258   :  { %v252_v22 = vadd.f32 %v309_v21, %v274_v19 }
 0x25a   :  { %255 = vst [vmem:[#allocation7] sm:$0xff] %v252_v22 }
 0x25b   :  { %423 = shalt.err (!%p420_p6)
}
 0x25c   :  { %s424_s23 = scalar_lea.hbm %s522_s4, 128 }
 0x25d   :  { %p425_p7 = scmp.ne.s32.totalorder %s522_s4, %s424_s23  ;;  %p428_p8 = scmp.lt.u32.totalorder %s424_s23, %s522_s4 }
 0x25f   :  { %p430_p9 = pnand %p428_p8, %p425_p7 }
 0x261   :  { %433 = shalt.err (!%p430_p9)
}
 0x262   :  { %265 = dma.vmem_to_hbm [thread:$0]  %s263_s19, 128, %s522_s4, [#allocation4]  }
 0x263   :  { %438 = dma.done.wait [#allocation4], 128  }
 0x264   :  { %439 = vsyncadd [#allocation4], 4294967168 }
 0x265   :  { %269 = vsyncpa [#allocation3], 1 }
 0x266   :  { %270 = vsyncpa [#allocation6], 1 }
 0x267   :  { %271 = vsyncpa [#allocation4], 1 }

</bundles_post_ra>
